<compile_context>
chip_gen: v7x
topology: tpu7x:2x2x1
jax: 0.10.0
libtpu: 0.0.40
codegen_flags: <defaults>
</compile_context>

<pallas_src>
import functools

import jax
import jax.numpy as jnp
from jax.experimental import pallas as pl
from jax.experimental.pallas import tpu as pltpu


# ---------------------------------------------------------------------------
# Stage 1: global-average-pool (as a sum; 1/HW folded in later)
# ---------------------------------------------------------------------------
def gap_kernel(x1_ref, x2_ref, f1_ref, f2_ref):
    # x*_ref: (tile_b, C, HW)  (full C, full HW per block)
    # f*_ref: (tile_b, C)      lane-dense output, one reduce+store per block
    f1_ref[...] = jnp.sum(x1_ref[...].astype(jnp.float32), axis=-1)
    f2_ref[...] = jnp.sum(x2_ref[...].astype(jnp.float32), axis=-1)


def _pick_tile_b(batch, row_bytes, block_budget_bytes):
    """Largest batch-axis tile that (a) divides `batch`, (b) keeps one input
    block under `block_budget_bytes`, and (c) satisfies the Mosaic layout rule
    for the (tile_b, C) output block (multiple of 8, or the full batch)."""
    cap = max(1, block_budget_bytes // max(1, row_bytes))
    best = None
    for d in range(1, batch + 1):
        if batch % d != 0:
            continue
        if d % 8 != 0 and d != batch:
            continue
        if d <= cap:
            best = d
    if best is None:
        # No VMEM-friendly divisor under the cap; fall back to the full batch
        # (always a legal layout).  Only reachable for small/odd batches.
        best = batch
    return best


# ---------------------------------------------------------------------------
# Stage 2: fused backbone linear + projector/predictor/target MLPs + loss
# ---------------------------------------------------------------------------
def _head_kernel(f1_ref, f2_ref,
                 wback_ref, bback_ref,
                 pw1_ref, pb1_ref, pg1_ref, pbe1_ref, pw2_ref, pb2_ref,
                 tw1_ref, tb1_ref, tg1_ref, tbe1_ref, tw2_ref, tb2_ref,
                 qw1_ref, qb1_ref, qg1_ref, qbe1_ref, qw2_ref, qb2_ref,
                 loss_ref, *, inv_hw, batch, repre_dim, mxu_dtype):
    def mm(a, w_ref):
        # MXU matmul: activations cast to mxu_dtype here; weights were cast
        # once in the wrapper (astype is a no-op if already matching); f32 acc.
        return jnp.dot(a.astype(mxu_dtype), w_ref[...].astype(mxu_dtype),
                       preferred_element_type=jnp.float32)

    def bn_per_view(a, g_ref, be_ref):
        # BatchNorm1d, train-mode batch stats (eps=1e-5), computed PER VIEW
        # (views are stacked along rows: [0:B] = view 1, [B:2B] = view 2).
        def norm(v):
            mu = jnp.mean(v, axis=0, keepdims=True)
            var = jnp.mean(jnp.square(v - mu), axis=0, keepdims=True)
            return (v - mu) * jax.lax.rsqrt(var + 1e-5)
        a = jnp.concatenate([norm(a[:batch]), norm(a[batch:])], axis=0)
        return a * g_ref[...] + be_ref[...]

    def mlp(h, w1_ref, b1_ref, g_ref, be_ref, w2_ref, b2_ref):
        # Linear -> BatchNorm1d (per-view batch stats) -> ReLU -> Linear,
        # with both views stacked through every GEMM.
        a = mm(h, w1_ref) + b1_ref[...]
        a = bn_per_view(a, g_ref, be_ref)
        a = jnp.maximum(a, 0.0)
        return mm(a, w2_ref) + b2_ref[...]

    def cosine(a, b):
        # F.cosine_similarity-style semantics (per-row, eps-clamped norms).
        eps = 1e-8
        dot = jnp.sum(a * b, axis=-1, keepdims=True)
        na = jnp.maximum(jnp.sqrt(jnp.sum(a * a, axis=-1, keepdims=True)), eps)
        nb = jnp.maximum(jnp.sqrt(jnp.sum(b * b, axis=-1, keepdims=True)), eps)
        return dot / (na * nb)

    # GAP finalize: pooled sums * (1/HW) constant; views stacked -> [2B, C].
    feats = jnp.concatenate([f1_ref[...], f2_ref[...]], axis=0) * inv_hw

    # Fused online+target backbone linear: [2B, C] @ [C, 2R] -> split columns.
    h = mm(feats, wback_ref) + bback_ref[...]
    h_on = h[:, :repre_dim]
    h_tg = h[:, repre_dim:]

    # Online projector + predictor; target projector (no_grad branch, forward
    # value only).  Each MLP runs once with both views stacked.
    z = mlp(h_on, pw1_ref, pb1_ref, pg1_ref, pbe1_ref, pw2_ref, pb2_ref)
    p = mlp(z, qw1_ref, qb1_ref, qg1_ref, qbe1_ref, qw2_ref, qb2_ref)
    z_hat = mlp(h_tg, tw1_ref, tb1_ref, tg1_ref, tbe1_ref, tw2_ref, tb2_ref)

    # Cross-pair: p1<->z2_hat, p2<->z1_hat.  mean over the 2B cross pairs
    # equals 0.5 * (mean cos(p1, z2_hat) + mean cos(p2, z1_hat)), so
    # loss = 1 - mean_2B == 1 - 0.5 * sim (exactly the PyTorch loss_fn).
    z_cross = jnp.concatenate([z_hat[batch:], z_hat[:batch]], axis=0)
    loss_ref[0, 0] = 1.0 - jnp.mean(cosine(p, z_cross))


# ---------------------------------------------------------------------------
# Wrapper
# ---------------------------------------------------------------------------
def byol_forward(x1, x2, params, *, mxu_dtype=jnp.float32,
                 gap_block_bytes=8 * 1024 * 1024):
    B, C, H, W = x1.shape
    HW = H * W

    # Free reshapes (contiguous NCHW -> [B, C, HW]); no concat, no pad.
    x1v = x1.reshape(B, C, HW)
    x2v = x2.reshape(B, C, HW)

    itemsize = jnp.dtype(x1.dtype).itemsize
    tile_b = _pick_tile_b(B, C * HW * itemsize, gap_block_bytes)
    grid = (B // tile_b,)

    # --- Stage 1: pipelined GAP, batch axis parallel, lane-dense output -----
    # VMEM ~ 2 views x 2 buffers x (tile_b*C*HW*itemsize) + tiny outputs;
    # default budget keeps this <= ~32 MiB (safe on v7x's 64 MiB physical);
    # raise gap_block_bytes on v5e/v6e (128 MiB VMEM) for larger blocks.
    feats1, feats2 = pl.pallas_call(
        gap_kernel,
        out_shape=(jax.ShapeDtypeStruct((B, C), jnp.float32),
                   jax.ShapeDtypeStruct((B, C), jnp.float32)),
        grid=grid,
        in_specs=[pl.BlockSpec((tile_b, C, HW), lambda i: (i, 0, 0)),
                  pl.BlockSpec((tile_b, C, HW), lambda i: (i, 0, 0))],
        out_specs=[pl.BlockSpec((tile_b, C), lambda i: (i, 0)),
                   pl.BlockSpec((tile_b, C), lambda i: (i, 0))],
        compiler_params=pltpu.CompilerParams(
            dimension_semantics=("parallel",),
            vmem_limit_bytes=48 * 1024 * 1024),
    )(x1v, x2v)

    # --- Stage 2: head -------------------------------------------------------
    (wb, bb, wbt, bbt,
     pw1, pb1, pg1, pbe1, pw2, pb2,
     tw1, tb1, tg1, tbe1, tw2, tb2,
     qw1, qb1, qg1, qbe1, qw2, qb2) = params

    # Fuse online + target backbone weights: [C, R] ++ [C, R] -> [C, 2R].
    w_back = jnp.concatenate([wb, wbt], axis=1)
    b_back = jnp.concatenate([bb, bbt], axis=1)

    # Cast matmul weights to the MXU dtype once (bf16 halves weight DMA/VMEM);
    # biases / BN params stay f32 (added after the f32 accumulation).
    def wcast(w):
        return w.astype(mxu_dtype)

    head_args = (
        feats1, feats2,
        wcast(w_back), b_back,
        wcast(pw1), pb1, pg1, pbe1, wcast(pw2), pb2,
        wcast(tw1), tb1, tg1, tbe1, wcast(tw2), tb2,
        wcast(qw1), qb1, qg1, qbe1, wcast(qw2), qb2,
    )

    head = functools.partial(_head_kernel, inv_hw=1.0 / HW, batch=B,
                             repre_dim=wb.shape[1], mxu_dtype=mxu_dtype)
    loss = pl.pallas_call(
        head,
        out_shape=jax.ShapeDtypeStruct((1, 1), jnp.float32),
        in_specs=[pl.BlockSpec(memory_space=pltpu.MemorySpace.VMEM)
                  for _ in head_args],
        out_specs=pl.BlockSpec(memory_space=pltpu.MemorySpace.SMEM),
        compiler_params=pltpu.CompilerParams(
            vmem_limit_bytes=32 * 1024 * 1024),
    )(*head_args)
    return loss[0, 0]


# ---------------------------------------------------------------------------
# Pure-JAX reference (mirrors the PyTorch forward semantics; optional bf16
# MXU-operand casting so the reduced-precision kernel path can be checked
# against a precision-matched reference)
# ---------------------------------------------------------------------------
def byol_forward_ref(x1, x2, params, mxu_dtype=jnp.float32):
    (wb, bb, wbt, bbt,
     pw1, pb1, pg1, pbe1, pw2, pb2,
     tw1, tb1, tg1, tbe1, tw2, tb2,
     qw1, qb1, qg1, qbe1, qw2, qb2) = params

    def mm(a, w):
        return jnp.dot(a.astype(mxu_dtype), w.astype(mxu_dtype),
                       preferred_element_type=jnp.float32)

    def backbone(x, w, b):
        feats = jnp.mean(x.reshape(x.shape[0], x.shape[1], -1), axis=-1)
        return mm(feats, w) + b

    def mlp(h, w1, b1, g, be, w2, b2):
        a = mm(h, w1) + b1
        mu = jnp.mean(a, axis=0, keepdims=True)
        var = jnp.mean(jnp.square(a - mu), axis=0, keepdims=True)
        a = (a - mu) * jax.lax.rsqrt(var + 1e-5) * g + be
        a = jnp.maximum(a, 0.0)
        return mm(a, w2) + b2

    def cosine(a, b):
        eps = 1e-8
        dot = jnp.sum(a * b, axis=-1)
        na = jnp.maximum(jnp.sqrt(jnp.sum(a * a, axis=-1)), eps)
        nb = jnp.maximum(jnp.sqrt(jnp.sum(b * b, axis=-1)), eps)
        return dot / (na * nb)

    z1 = mlp(backbone(x1, wb, bb), pw1, pb1, pg1, pbe1, pw2, pb2)
    z2 = mlp(backbone(x2, wb, bb), pw1, pb1, pg1, pbe1, pw2, pb2)
    p1 = mlp(z1, qw1, qb1, qg1, qbe1, qw2, qb2)
    p2 = mlp(z2, qw1, qb1, qg1, qbe1, qw2, qb2)
    z1_hat = jax.lax.stop_gradient(
        mlp(backbone(x1, wbt, bbt), tw1, tb1, tg1, tbe1, tw2, tb2))
    z2_hat = jax.lax.stop_gradient(
        mlp(backbone(x2, wbt, bbt), tw1, tb1, tg1, tbe1, tw2, tb2))
    sim = jnp.mean(cosine(p1, z2_hat)) + jnp.mean(cosine(p2, z1_hat))
    return 1.0 - 0.5 * sim


# ---------------------------------------------------------------------------
# Parameter construction (deterministic, synthetic)
# ---------------------------------------------------------------------------
def make_mlp_params(key, din, dhid, dout):
    k1, k2, k3, k4 = jax.random.split(key, 4)
    w1 = jax.random.normal(k1, (din, dhid), jnp.float32) * 0.05
    b1 = jax.random.normal(k2, (1, dhid), jnp.float32) * 0.01
    g1 = jnp.ones((1, dhid), jnp.float32)      # BN gamma
    be1 = jnp.zeros((1, dhid), jnp.float32)    # BN beta
    w2 = jax.random.normal(k3, (dhid, dout), jnp.float32) * 0.05
    b2 = jax.random.normal(k4, (1, dout), jnp.float32) * 0.01
    return (w1, b1, g1, be1, w2, b2)


if __name__ == "__main__":
    # small shapes consistent with the module: NCHW images, scaled-down dims
    # NOTE: at production shapes keep 2B / repre_dim / hidden / z_dim multiples
    # of 128 (ideally 256) and B a multiple of 8 for MXU fill and clean splits.
    B, C, H, W = 2, 4, 16, 16
    REPRE_DIM = 32
    PROJ_HIDDEN = (64, 32)          # scaled-down analogue of (4096, 256)
    Z_DIM = PROJ_HIDDEN[-1]

    key = jax.random.PRNGKey(0)
    kx1, kx2, kb, kproj, kpred = jax.random.split(key, 5)

    x1 = jax.random.normal(kx1, (B, C, H, W), jnp.float32)
    x2 = jax.random.normal(kx2, (B, C, H, W), jnp.float32)

    # synthetic backbone: GAP + Linear(C -> repre_dim), weights pre-transposed
    kbw, kbb = jax.random.split(kb)
    wb = jax.random.normal(kbw, (C, REPRE_DIM), jnp.float32) * 0.1
    bb = jax.random.normal(kbb, (1, REPRE_DIM), jnp.float32) * 0.01

    proj = make_mlp_params(kproj, REPRE_DIM, PROJ_HIDDEN[0], PROJ_HIDDEN[1])
    pred = make_mlp_params(kpred, Z_DIM, PROJ_HIDDEN[0], PROJ_HIDDEN[1])

    # target networks: deepcopy semantics -> identical initial weights
    wbt, bbt = wb, bb
    proj_t = proj

    params = (wb, bb, wbt, bbt) + proj + proj_t + pred

    # f32 MXU path: faithful to the PyTorch f32 forward
    run_f32 = jax.jit(functools.partial(byol_forward, mxu_dtype=jnp.float32))
    loss_f32 = jax.block_until_ready(run_f32(x1, x2, params))
    ref_f32 = byol_forward_ref(x1, x2, params, mxu_dtype=jnp.float32)
    assert jnp.allclose(loss_f32, ref_f32, rtol=2e-3, atol=2e-3), (loss_f32, ref_f32)

    # bf16 MXU-operand path (f32 accumulation) vs precision-matched reference
    run_bf16 = jax.jit(functools.partial(byol_forward, mxu_dtype=jnp.bfloat16))
    loss_bf16 = jax.block_until_ready(run_bf16(x1, x2, params))
    ref_bf16 = byol_forward_ref(x1, x2, params, mxu_dtype=jnp.bfloat16)
    assert jnp.allclose(loss_bf16, ref_bf16, rtol=2e-3, atol=2e-3), (loss_bf16, ref_bf16)

    print("KERNEL_OK")
</pallas_src>

<mosaic_0001>
module attributes {stable_mosaic.version = 11 : i64} {
  func.func @gap_kernel(%arg0: i32, %arg1: memref<2x4x256xf32, #tpu.memory_space<vmem>>, %arg2: memref<2x4x256xf32, #tpu.memory_space<vmem>>, %arg3: memref<2x4xf32, #tpu.memory_space<vmem>>, %arg4: memref<2x4xf32, #tpu.memory_space<vmem>>) attributes {dimension_semantics = [#tpu.dimension_semantics<parallel>], iteration_bounds = array<i64: 1>, scalar_prefetch = 0 : i64, scratch_operands = 0 : i64, tpu.core_type = #tpu.core_type<tc>, window_params = [{transform_indices = @transform_0, window_bounds = array<i64: 2, 4, 256>}, {transform_indices = @transform_1, window_bounds = array<i64: 2, 4, 256>}, {transform_indices = @transform_2, window_bounds = array<i64: 2, 4>}, {transform_indices = @transform_3, window_bounds = array<i64: 2, 4>}]} {
    %c0 = arith.constant 0 : index
    %c0_0 = arith.constant 0 : index
    %c0_1 = arith.constant 0 : index
    %0 = vector.load %arg1[%c0, %c0_0, %c0_1] : memref<2x4x256xf32, #tpu.memory_space<vmem>>, vector<2x4x256xf32>
    %cst = arith.constant dense<0.000000e+00> : vector<2x4xf32>
    %1 = vector.multi_reduction <add>, %0, %cst [2] : vector<2x4x256xf32> to vector<2x4xf32>
    %c0_2 = arith.constant 0 : index
    %c0_3 = arith.constant 0 : index
    %2 = vector.load %arg3[%c0_2, %c0_3] : memref<2x4xf32, #tpu.memory_space<vmem>>, vector<2x4xf32>
    tpu.vector_store %arg3[%c0_2, %c0_3], %1 {strides = array<i32>} : memref<2x4xf32, #tpu.memory_space<vmem>>, vector<2x4xf32>,
    %c0_4 = arith.constant 0 : index
    %c0_5 = arith.constant 0 : index
    %c0_6 = arith.constant 0 : index
    %3 = vector.load %arg2[%c0_4, %c0_5, %c0_6] : memref<2x4x256xf32, #tpu.memory_space<vmem>>, vector<2x4x256xf32>
    %cst_7 = arith.constant dense<0.000000e+00> : vector<2x4xf32>
    %4 = vector.multi_reduction <add>, %3, %cst_7 [2] : vector<2x4x256xf32> to vector<2x4xf32>
    %c0_8 = arith.constant 0 : index
    %c0_9 = arith.constant 0 : index
    %5 = vector.load %arg4[%c0_8, %c0_9] : memref<2x4xf32, #tpu.memory_space<vmem>>, vector<2x4xf32>
    tpu.vector_store %arg4[%c0_8, %c0_9], %4 {strides = array<i32>} : memref<2x4xf32, #tpu.memory_space<vmem>>, vector<2x4xf32>,
    return
  }
  func.func @transform_0(%arg0: i32) -> (i32, i32, i32) {
    %c0_i32 = arith.constant 0 : i32
    %c0_i32_0 = arith.constant 0 : i32
    %c0_i32_1 = arith.constant 0 : i32
    return %arg0, %c0_i32, %c0_i32_0 : i32, i32, i32
  }
  func.func @transform_1(%arg0: i32) -> (i32, i32, i32) {
    %c0_i32 = arith.constant 0 : i32
    %c0_i32_0 = arith.constant 0 : i32
    %c0_i32_1 = arith.constant 0 : i32
    return %arg0, %c0_i32, %c0_i32_0 : i32, i32, i32
  }
  func.func @transform_2(%arg0: i32) -> (i32, i32) {
    %c0_i32 = arith.constant 0 : i32
    %c0_i32_0 = arith.constant 0 : i32
    return %arg0, %c0_i32 : i32, i32
  }
  func.func @transform_3(%arg0: i32) -> (i32, i32) {
    %c0_i32 = arith.constant 0 : i32
    %c0_i32_0 = arith.constant 0 : i32
    return %arg0, %c0_i32 : i32, i32
  }
}

module attributes {stable_mosaic.version = 11 : i64} {
  func.func @_head_kernel(%arg0: memref<2x4xf32, #tpu.memory_space<vmem>>, %arg1: memref<2x4xf32, #tpu.memory_space<vmem>>, %arg2: memref<4x64xf32, #tpu.memory_space<vmem>>, %arg3: memref<1x64xf32, #tpu.memory_space<vmem>>, %arg4: memref<32x64xf32, #tpu.memory_space<vmem>>, %arg5: memref<1x64xf32, #tpu.memory_space<vmem>>, %arg6: memref<1x64xf32, #tpu.memory_space<vmem>>, %arg7: memref<1x64xf32, #tpu.memory_space<vmem>>, %arg8: memref<64x32xf32, #tpu.memory_space<vmem>>, %arg9: memref<1x32xf32, #tpu.memory_space<vmem>>, %arg10: memref<32x64xf32, #tpu.memory_space<vmem>>, %arg11: memref<1x64xf32, #tpu.memory_space<vmem>>, %arg12: memref<1x64xf32, #tpu.memory_space<vmem>>, %arg13: memref<1x64xf32, #tpu.memory_space<vmem>>, %arg14: memref<64x32xf32, #tpu.memory_space<vmem>>, %arg15: memref<1x32xf32, #tpu.memory_space<vmem>>, %arg16: memref<32x64xf32, #tpu.memory_space<vmem>>, %arg17: memref<1x64xf32, #tpu.memory_space<vmem>>, %arg18: memref<1x64xf32, #tpu.memory_space<vmem>>, %arg19: memref<1x64xf32, #tpu.memory_space<vmem>>, %arg20: memref<64x32xf32, #tpu.memory_space<vmem>>, %arg21: memref<1x32xf32, #tpu.memory_space<vmem>>, %arg22: memref<1x1xf32, #tpu.memory_space<smem>>) attributes {dimension_semantics = [], scalar_prefetch = 0 : i64, scratch_operands = 0 : i64, tpu.core_type = #tpu.core_type<tc>} {
    %c0 = arith.constant 0 : index
    %c0_0 = arith.constant 0 : index
    %0 = vector.load %arg0[%c0, %c0_0] : memref<2x4xf32, #tpu.memory_space<vmem>>, vector<2x4xf32>
    %c0_1 = arith.constant 0 : index
    %c0_2 = arith.constant 0 : index
    %1 = vector.load %arg1[%c0_1, %c0_2] : memref<2x4xf32, #tpu.memory_space<vmem>>, vector<2x4xf32>
    %2 = tpu.concatenate %0, %1 in 0 : vector<2x4xf32>, vector<2x4xf32> -> vector<4x4xf32>
    %cst = arith.constant 3.906250e-03 : f32
    %3 = vector.broadcast %cst : f32 to vector<4x4xf32>
    %4 = arith.mulf %2, %3 : vector<4x4xf32>
    %c0_3 = arith.constant 0 : index
    %c0_4 = arith.constant 0 : index
    %5 = vector.load %arg2[%c0_3, %c0_4] : memref<4x64xf32, #tpu.memory_space<vmem>>, vector<4x64xf32>
    %cst_5 = arith.constant dense<0.000000e+00> : vector<4x64xf32>
    %6 = tpu.matmul %4, %5, %cst_5 {dimension_numbers = #tpu.dot_dimension_numbers<[1], [0], [0], [1], [0, 0, 1, 1], [], []>} : vector<4x4xf32>, vector<4x64xf32>, vector<4x64xf32> -> vector<4x64xf32>
    %c0_6 = arith.constant 0 : index
    %c0_7 = arith.constant 0 : index
    %7 = vector.load %arg3[%c0_6, %c0_7] : memref<1x64xf32, #tpu.memory_space<vmem>>, vector<1x64xf32>
    %8 = vector.broadcast %7 : vector<1x64xf32> to vector<4x64xf32>
    %9 = arith.addf %6, %8 : vector<4x64xf32>
    %10 = vector.extract_strided_slice %9 {offsets = [0, 0], sizes = [4, 32], strides = [1, 1]} : vector<4x64xf32> to vector<4x32xf32>
    %11 = vector.extract_strided_slice %9 {offsets = [0, 32], sizes = [4, 32], strides = [1, 1]} : vector<4x64xf32> to vector<4x32xf32>
    %c0_8 = arith.constant 0 : index
    %c0_9 = arith.constant 0 : index
    %12 = vector.load %arg4[%c0_8, %c0_9] : memref<32x64xf32, #tpu.memory_space<vmem>>, vector<32x64xf32>
    %cst_10 = arith.constant dense<0.000000e+00> : vector<4x64xf32>
    %13 = tpu.matmul %10, %12, %cst_10 {dimension_numbers = #tpu.dot_dimension_numbers<[1], [0], [0], [1], [0, 0, 1, 1], [], []>} : vector<4x32xf32>, vector<32x64xf32>, vector<4x64xf32> -> vector<4x64xf32>
    %c0_11 = arith.constant 0 : index
    %c0_12 = arith.constant 0 : index
    %14 = vector.load %arg5[%c0_11, %c0_12] : memref<1x64xf32, #tpu.memory_space<vmem>>, vector<1x64xf32>
    %15 = vector.broadcast %14 : vector<1x64xf32> to vector<4x64xf32>
    %16 = arith.addf %13, %15 : vector<4x64xf32>
    %17 = vector.extract_strided_slice %16 {offsets = [0, 0], sizes = [2, 64], strides = [1, 1]} : vector<4x64xf32> to vector<2x64xf32>
    %cst_13 = arith.constant dense<0.000000e+00> : vector<64xf32>
    %18 = vector.multi_reduction <add>, %17, %cst_13 [0] : vector<2x64xf32> to vector<64xf32>
    %19 = vector.shape_cast %18 : vector<64xf32> to vector<1x64xf32>
    %cst_14 = arith.constant 2.000000e+00 : f32
    %20 = vector.broadcast %cst_14 : f32 to vector<1x64xf32>
    %21 = arith.divf %19, %20 : vector<1x64xf32>
    %22 = vector.broadcast %21 : vector<1x64xf32> to vector<2x64xf32>
    %23 = arith.subf %17, %22 : vector<2x64xf32>
    %24 = arith.mulf %23, %23 : vector<2x64xf32>
    %cst_15 = arith.constant dense<0.000000e+00> : vector<64xf32>
    %25 = vector.multi_reduction <add>, %24, %cst_15 [0] : vector<2x64xf32> to vector<64xf32>
    %26 = vector.shape_cast %25 : vector<64xf32> to vector<1x64xf32>
    %cst_16 = arith.constant 2.000000e+00 : f32
    %27 = vector.broadcast %cst_16 : f32 to vector<1x64xf32>
    %28 = arith.divf %26, %27 : vector<1x64xf32>
    %29 = vector.broadcast %21 : vector<1x64xf32> to vector<2x64xf32>
    %30 = arith.subf %17, %29 : vector<2x64xf32>
    %cst_17 = arith.constant 9.99999974E-6 : f32
    %31 = vector.broadcast %cst_17 : f32 to vector<1x64xf32>
    %32 = arith.addf %28, %31 : vector<1x64xf32>
    %33 = math.rsqrt %32 : vector<1x64xf32>
    %34 = vector.broadcast %33 : vector<1x64xf32> to vector<2x64xf32>
    %35 = arith.mulf %30, %34 : vector<2x64xf32>
    %36 = vector.extract_strided_slice %16 {offsets = [2, 0], sizes = [2, 64], strides = [1, 1]} : vector<4x64xf32> to vector<2x64xf32>
    %cst_18 = arith.constant dense<0.000000e+00> : vector<64xf32>
    %37 = vector.multi_reduction <add>, %36, %cst_18 [0] : vector<2x64xf32> to vector<64xf32>
    %38 = vector.shape_cast %37 : vector<64xf32> to vector<1x64xf32>
    %cst_19 = arith.constant 2.000000e+00 : f32
    %39 = vector.broadcast %cst_19 : f32 to vector<1x64xf32>
    %40 = arith.divf %38, %39 : vector<1x64xf32>
    %41 = vector.broadcast %40 : vector<1x64xf32> to vector<2x64xf32>
    %42 = arith.subf %36, %41 : vector<2x64xf32>
    %43 = arith.mulf %42, %42 : vector<2x64xf32>
    %cst_20 = arith.constant dense<0.000000e+00> : vector<64xf32>
    %44 = vector.multi_reduction <add>, %43, %cst_20 [0] : vector<2x64xf32> to vector<64xf32>
    %45 = vector.shape_cast %44 : vector<64xf32> to vector<1x64xf32>
    %cst_21 = arith.constant 2.000000e+00 : f32
    %46 = vector.broadcast %cst_21 : f32 to vector<1x64xf32>
    %47 = arith.divf %45, %46 : vector<1x64xf32>
    %48 = vector.broadcast %40 : vector<1x64xf32> to vector<2x64xf32>
    %49 = arith.subf %36, %48 : vector<2x64xf32>
    %cst_22 = arith.constant 9.99999974E-6 : f32
    %50 = vector.broadcast %cst_22 : f32 to vector<1x64xf32>
    %51 = arith.addf %47, %50 : vector<1x64xf32>
    %52 = math.rsqrt %51 : vector<1x64xf32>
    %53 = vector.broadcast %52 : vector<1x64xf32> to vector<2x64xf32>
    %54 = arith.mulf %49, %53 : vector<2x64xf32>
    %55 = tpu.concatenate %35, %54 in 0 : vector<2x64xf32>, vector<2x64xf32> -> vector<4x64xf32>
    %c0_23 = arith.constant 0 : index
    %c0_24 = arith.constant 0 : index
    %56 = vector.load %arg6[%c0_23, %c0_24] : memref<1x64xf32, #tpu.memory_space<vmem>>, vector<1x64xf32>
    %57 = vector.broadcast %56 : vector<1x64xf32> to vector<4x64xf32>
    %58 = arith.mulf %55, %57 : vector<4x64xf32>
    %c0_25 = arith.constant 0 : index
    %c0_26 = arith.constant 0 : index
    %59 = vector.load %arg7[%c0_25, %c0_26] : memref<1x64xf32, #tpu.memory_space<vmem>>, vector<1x64xf32>
    %60 = vector.broadcast %59 : vector<1x64xf32> to vector<4x64xf32>
    %61 = arith.addf %58, %60 : vector<4x64xf32>
    %cst_27 = arith.constant 0.000000e+00 : f32
    %62 = vector.broadcast %cst_27 : f32 to vector<4x64xf32>
    %63 = arith.maximumf %61, %62 : vector<4x64xf32>
    %c0_28 = arith.constant 0 : index
    %c0_29 = arith.constant 0 : index
    %64 = vector.load %arg8[%c0_28, %c0_29] : memref<64x32xf32, #tpu.memory_space<vmem>>, vector<64x32xf32>
    %cst_30 = arith.constant dense<0.000000e+00> : vector<4x32xf32>
    %65 = tpu.matmul %63, %64, %cst_30 {dimension_numbers = #tpu.dot_dimension_numbers<[1], [0], [0], [1], [0, 0, 1, 1], [], []>} : vector<4x64xf32>, vector<64x32xf32>, vector<4x32xf32> -> vector<4x32xf32>
    %c0_31 = arith.constant 0 : index
    %c0_32 = arith.constant 0 : index
    %66 = vector.load %arg9[%c0_31, %c0_32] : memref<1x32xf32, #tpu.memory_space<vmem>>, vector<1x32xf32>
    %67 = vector.broadcast %66 : vector<1x32xf32> to vector<4x32xf32>
    %68 = arith.addf %65, %67 : vector<4x32xf32>
    %c0_33 = arith.constant 0 : index
    %c0_34 = arith.constant 0 : index
    %69 = vector.load %arg16[%c0_33, %c0_34] : memref<32x64xf32, #tpu.memory_space<vmem>>, vector<32x64xf32>
    %cst_35 = arith.constant dense<0.000000e+00> : vector<4x64xf32>
    %70 = tpu.matmul %68, %69, %cst_35 {dimension_numbers = #tpu.dot_dimension_numbers<[1], [0], [0], [1], [0, 0, 1, 1], [], []>} : vector<4x32xf32>, vector<32x64xf32>, vector<4x64xf32> -> vector<4x64xf32>
    %c0_36 = arith.constant 0 : index
    %c0_37 = arith.constant 0 : index
    %71 = vector.load %arg17[%c0_36, %c0_37] : memref<1x64xf32, #tpu.memory_space<vmem>>, vector<1x64xf32>
    %72 = vector.broadcast %71 : vector<1x64xf32> to vector<4x64xf32>
    %73 = arith.addf %70, %72 : vector<4x64xf32>
    %74 = vector.extract_strided_slice %73 {offsets = [0, 0], sizes = [2, 64], strides = [1, 1]} : vector<4x64xf32> to vector<2x64xf32>
    %cst_38 = arith.constant dense<0.000000e+00> : vector<64xf32>
    %75 = vector.multi_reduction <add>, %74, %cst_38 [0] : vector<2x64xf32> to vector<64xf32>
    %76 = vector.shape_cast %75 : vector<64xf32> to vector<1x64xf32>
    %cst_39 = arith.constant 2.000000e+00 : f32
    %77 = vector.broadcast %cst_39 : f32 to vector<1x64xf32>
    %78 = arith.divf %76, %77 : vector<1x64xf32>
    %79 = vector.broadcast %78 : vector<1x64xf32> to vector<2x64xf32>
    %80 = arith.subf %74, %79 : vector<2x64xf32>
    %81 = arith.mulf %80, %80 : vector<2x64xf32>
    %cst_40 = arith.constant dense<0.000000e+00> : vector<64xf32>
    %82 = vector.multi_reduction <add>, %81, %cst_40 [0] : vector<2x64xf32> to vector<64xf32>
    %83 = vector.shape_cast %82 : vector<64xf32> to vector<1x64xf32>
    %cst_41 = arith.constant 2.000000e+00 : f32
    %84 = vector.broadcast %cst_41 : f32 to vector<1x64xf32>
    %85 = arith.divf %83, %84 : vector<1x64xf32>
    %86 = vector.broadcast %78 : vector<1x64xf32> to vector<2x64xf32>
    %87 = arith.subf %74, %86 : vector<2x64xf32>
    %cst_42 = arith.constant 9.99999974E-6 : f32
    %88 = vector.broadcast %cst_42 : f32 to vector<1x64xf32>
    %89 = arith.addf %85, %88 : vector<1x64xf32>
    %90 = math.rsqrt %89 : vector<1x64xf32>
    %91 = vector.broadcast %90 : vector<1x64xf32> to vector<2x64xf32>
    %92 = arith.mulf %87, %91 : vector<2x64xf32>
    %93 = vector.extract_strided_slice %73 {offsets = [2, 0], sizes = [2, 64], strides = [1, 1]} : vector<4x64xf32> to vector<2x64xf32>
    %cst_43 = arith.constant dense<0.000000e+00> : vector<64xf32>
    %94 = vector.multi_reduction <add>, %93, %cst_43 [0] : vector<2x64xf32> to vector<64xf32>
    %95 = vector.shape_cast %94 : vector<64xf32> to vector<1x64xf32>
    %cst_44 = arith.constant 2.000000e+00 : f32
    %96 = vector.broadcast %cst_44 : f32 to vector<1x64xf32>
    %97 = arith.divf %95, %96 : vector<1x64xf32>
    %98 = vector.broadcast %97 : vector<1x64xf32> to vector<2x64xf32>
    %99 = arith.subf %93, %98 : vector<2x64xf32>
    %100 = arith.mulf %99, %99 : vector<2x64xf32>
    %cst_45 = arith.constant dense<0.000000e+00> : vector<64xf32>
    %101 = vector.multi_reduction <add>, %100, %cst_45 [0] : vector<2x64xf32> to vector<64xf32>
    %102 = vector.shape_cast %101 : vector<64xf32> to vector<1x64xf32>
    %cst_46 = arith.constant 2.000000e+00 : f32
    %103 = vector.broadcast %cst_46 : f32 to vector<1x64xf32>
    %104 = arith.divf %102, %103 : vector<1x64xf32>
    %105 = vector.broadcast %97 : vector<1x64xf32> to vector<2x64xf32>
    %106 = arith.subf %93, %105 : vector<2x64xf32>
    %cst_47 = arith.constant 9.99999974E-6 : f32
    %107 = vector.broadcast %cst_47 : f32 to vector<1x64xf32>
    %108 = arith.addf %104, %107 : vector<1x64xf32>
    %109 = math.rsqrt %108 : vector<1x64xf32>
    %110 = vector.broadcast %109 : vector<1x64xf32> to vector<2x64xf32>
    %111 = arith.mulf %106, %110 : vector<2x64xf32>
    %112 = tpu.concatenate %92, %111 in 0 : vector<2x64xf32>, vector<2x64xf32> -> vector<4x64xf32>
    %c0_48 = arith.constant 0 : index
    %c0_49 = arith.constant 0 : index
    %113 = vector.load %arg18[%c0_48, %c0_49] : memref<1x64xf32, #tpu.memory_space<vmem>>, vector<1x64xf32>
    %114 = vector.broadcast %113 : vector<1x64xf32> to vector<4x64xf32>
    %115 = arith.mulf %112, %114 : vector<4x64xf32>
    %c0_50 = arith.constant 0 : index
    %c0_51 = arith.constant 0 : index
    %116 = vector.load %arg19[%c0_50, %c0_51] : memref<1x64xf32, #tpu.memory_space<vmem>>, vector<1x64xf32>
    %117 = vector.broadcast %116 : vector<1x64xf32> to vector<4x64xf32>
    %118 = arith.addf %115, %117 : vector<4x64xf32>
    %cst_52 = arith.constant 0.000000e+00 : f32
    %119 = vector.broadcast %cst_52 : f32 to vector<4x64xf32>
    %120 = arith.maximumf %118, %119 : vector<4x64xf32>
    %c0_53 = arith.constant 0 : index
    %c0_54 = arith.constant 0 : index
    %121 = vector.load %arg20[%c0_53, %c0_54] : memref<64x32xf32, #tpu.memory_space<vmem>>, vector<64x32xf32>
    %cst_55 = arith.constant dense<0.000000e+00> : vector<4x32xf32>
    %122 = tpu.matmul %120, %121, %cst_55 {dimension_numbers = #tpu.dot_dimension_numbers<[1], [0], [0], [1], [0, 0, 1, 1], [], []>} : vector<4x64xf32>, vector<64x32xf32>, vector<4x32xf32> -> vector<4x32xf32>
    %c0_56 = arith.constant 0 : index
    %c0_57 = arith.constant 0 : index
    %123 = vector.load %arg21[%c0_56, %c0_57] : memref<1x32xf32, #tpu.memory_space<vmem>>, vector<1x32xf32>
    %124 = vector.broadcast %123 : vector<1x32xf32> to vector<4x32xf32>
    %125 = arith.addf %122, %124 : vector<4x32xf32>
    %c0_58 = arith.constant 0 : index
    %c0_59 = arith.constant 0 : index
    %126 = vector.load %arg10[%c0_58, %c0_59] : memref<32x64xf32, #tpu.memory_space<vmem>>, vector<32x64xf32>
    %cst_60 = arith.constant dense<0.000000e+00> : vector<4x64xf32>
    %127 = tpu.matmul %11, %126, %cst_60 {dimension_numbers = #tpu.dot_dimension_numbers<[1], [0], [0], [1], [0, 0, 1, 1], [], []>} : vector<4x32xf32>, vector<32x64xf32>, vector<4x64xf32> -> vector<4x64xf32>
    %c0_61 = arith.constant 0 : index
    %c0_62 = arith.constant 0 : index
    %128 = vector.load %arg11[%c0_61, %c0_62] : memref<1x64xf32, #tpu.memory_space<vmem>>, vector<1x64xf32>
    %129 = vector.broadcast %128 : vector<1x64xf32> to vector<4x64xf32>
    %130 = arith.addf %127, %129 : vector<4x64xf32>
    %131 = vector.extract_strided_slice %130 {offsets = [0, 0], sizes = [2, 64], strides = [1, 1]} : vector<4x64xf32> to vector<2x64xf32>
    %cst_63 = arith.constant dense<0.000000e+00> : vector<64xf32>
    %132 = vector.multi_reduction <add>, %131, %cst_63 [0] : vector<2x64xf32> to vector<64xf32>
    %133 = vector.shape_cast %132 : vector<64xf32> to vector<1x64xf32>
    %cst_64 = arith.constant 2.000000e+00 : f32
    %134 = vector.broadcast %cst_64 : f32 to vector<1x64xf32>
    %135 = arith.divf %133, %134 : vector<1x64xf32>
    %136 = vector.broadcast %135 : vector<1x64xf32> to vector<2x64xf32>
    %137 = arith.subf %131, %136 : vector<2x64xf32>
    %138 = arith.mulf %137, %137 : vector<2x64xf32>
    %cst_65 = arith.constant dense<0.000000e+00> : vector<64xf32>
    %139 = vector.multi_reduction <add>, %138, %cst_65 [0] : vector<2x64xf32> to vector<64xf32>
    %140 = vector.shape_cast %139 : vector<64xf32> to vector<1x64xf32>
    %cst_66 = arith.constant 2.000000e+00 : f32
    %141 = vector.broadcast %cst_66 : f32 to vector<1x64xf32>
    %142 = arith.divf %140, %141 : vector<1x64xf32>
    %143 = vector.broadcast %135 : vector<1x64xf32> to vector<2x64xf32>
    %144 = arith.subf %131, %143 : vector<2x64xf32>
    %cst_67 = arith.constant 9.99999974E-6 : f32
    %145 = vector.broadcast %cst_67 : f32 to vector<1x64xf32>
    %146 = arith.addf %142, %145 : vector<1x64xf32>
    %147 = math.rsqrt %146 : vector<1x64xf32>
    %148 = vector.broadcast %147 : vector<1x64xf32> to vector<2x64xf32>
    %149 = arith.mulf %144, %148 : vector<2x64xf32>
    %150 = vector.extract_strided_slice %130 {offsets = [2, 0], sizes = [2, 64], strides = [1, 1]} : vector<4x64xf32> to vector<2x64xf32>
    %cst_68 = arith.constant dense<0.000000e+00> : vector<64xf32>
    %151 = vector.multi_reduction <add>, %150, %cst_68 [0] : vector<2x64xf32> to vector<64xf32>
    %152 = vector.shape_cast %151 : vector<64xf32> to vector<1x64xf32>
    %cst_69 = arith.constant 2.000000e+00 : f32
    %153 = vector.broadcast %cst_69 : f32 to vector<1x64xf32>
    %154 = arith.divf %152, %153 : vector<1x64xf32>
    %155 = vector.broadcast %154 : vector<1x64xf32> to vector<2x64xf32>
    %156 = arith.subf %150, %155 : vector<2x64xf32>
    %157 = arith.mulf %156, %156 : vector<2x64xf32>
    %cst_70 = arith.constant dense<0.000000e+00> : vector<64xf32>
    %158 = vector.multi_reduction <add>, %157, %cst_70 [0] : vector<2x64xf32> to vector<64xf32>
    %159 = vector.shape_cast %158 : vector<64xf32> to vector<1x64xf32>
    %cst_71 = arith.constant 2.000000e+00 : f32
    %160 = vector.broadcast %cst_71 : f32 to vector<1x64xf32>
    %161 = arith.divf %159, %160 : vector<1x64xf32>
    %162 = vector.broadcast %154 : vector<1x64xf32> to vector<2x64xf32>
    %163 = arith.subf %150, %162 : vector<2x64xf32>
    %cst_72 = arith.constant 9.99999974E-6 : f32
    %164 = vector.broadcast %cst_72 : f32 to vector<1x64xf32>
    %165 = arith.addf %161, %164 : vector<1x64xf32>
    %166 = math.rsqrt %165 : vector<1x64xf32>
    %167 = vector.broadcast %166 : vector<1x64xf32> to vector<2x64xf32>
    %168 = arith.mulf %163, %167 : vector<2x64xf32>
    %169 = tpu.concatenate %149, %168 in 0 : vector<2x64xf32>, vector<2x64xf32> -> vector<4x64xf32>
    %c0_73 = arith.constant 0 : index
    %c0_74 = arith.constant 0 : index
    %170 = vector.load %arg12[%c0_73, %c0_74] : memref<1x64xf32, #tpu.memory_space<vmem>>, vector<1x64xf32>
    %171 = vector.broadcast %170 : vector<1x64xf32> to vector<4x64xf32>
    %172 = arith.mulf %169, %171 : vector<4x64xf32>
    %c0_75 = arith.constant 0 : index
    %c0_76 = arith.constant 0 : index
    %173 = vector.load %arg13[%c0_75, %c0_76] : memref<1x64xf32, #tpu.memory_space<vmem>>, vector<1x64xf32>
    %174 = vector.broadcast %173 : vector<1x64xf32> to vector<4x64xf32>
    %175 = arith.addf %172, %174 : vector<4x64xf32>
    %cst_77 = arith.constant 0.000000e+00 : f32
    %176 = vector.broadcast %cst_77 : f32 to vector<4x64xf32>
    %177 = arith.maximumf %175, %176 : vector<4x64xf32>
    %c0_78 = arith.constant 0 : index
    %c0_79 = arith.constant 0 : index
    %178 = vector.load %arg14[%c0_78, %c0_79] : memref<64x32xf32, #tpu.memory_space<vmem>>, vector<64x32xf32>
    %cst_80 = arith.constant dense<0.000000e+00> : vector<4x32xf32>
    %179 = tpu.matmul %177, %178, %cst_80 {dimension_numbers = #tpu.dot_dimension_numbers<[1], [0], [0], [1], [0, 0, 1, 1], [], []>} : vector<4x64xf32>, vector<64x32xf32>, vector<4x32xf32> -> vector<4x32xf32>
    %c0_81 = arith.constant 0 : index
    %c0_82 = arith.constant 0 : index
    %180 = vector.load %arg15[%c0_81, %c0_82] : memref<1x32xf32, #tpu.memory_space<vmem>>, vector<1x32xf32>
    %181 = vector.broadcast %180 : vector<1x32xf32> to vector<4x32xf32>
    %182 = arith.addf %179, %181 : vector<4x32xf32>
    %183 = vector.extract_strided_slice %182 {offsets = [2, 0], sizes = [2, 32], strides = [1, 1]} : vector<4x32xf32> to vector<2x32xf32>
    %184 = vector.extract_strided_slice %182 {offsets = [0, 0], sizes = [2, 32], strides = [1, 1]} : vector<4x32xf32> to vector<2x32xf32>
    %185 = tpu.concatenate %183, %184 in 0 : vector<2x32xf32>, vector<2x32xf32> -> vector<4x32xf32>
    %186 = arith.mulf %125, %185 : vector<4x32xf32>
    %cst_83 = arith.constant dense<0.000000e+00> : vector<4xf32>
    %187 = vector.multi_reduction <add>, %186, %cst_83 [1] : vector<4x32xf32> to vector<4xf32>
    %188 = vector.shape_cast %187 : vector<4xf32> to vector<4x1xf32>
    %189 = arith.mulf %125, %125 : vector<4x32xf32>
    %cst_84 = arith.constant dense<0.000000e+00> : vector<4xf32>
    %190 = vector.multi_reduction <add>, %189, %cst_84 [1] : vector<4x32xf32> to vector<4xf32>
    %191 = vector.shape_cast %190 : vector<4xf32> to vector<4x1xf32>
    %192 = math.sqrt %191 : vector<4x1xf32>
    %cst_85 = arith.constant 9.99999993E-9 : f32
    %193 = vector.broadcast %cst_85 : f32 to vector<4x1xf32>
    %194 = arith.maximumf %192, %193 : vector<4x1xf32>
    %195 = arith.mulf %185, %185 : vector<4x32xf32>
    %cst_86 = arith.constant dense<0.000000e+00> : vector<4xf32>
    %196 = vector.multi_reduction <add>, %195, %cst_86 [1] : vector<4x32xf32> to vector<4xf32>
    %197 = vector.shape_cast %196 : vector<4xf32> to vector<4x1xf32>
    %198 = math.sqrt %197 : vector<4x1xf32>
    %cst_87 = arith.constant 9.99999993E-9 : f32
    %199 = vector.broadcast %cst_87 : f32 to vector<4x1xf32>
    %200 = arith.maximumf %198, %199 : vector<4x1xf32>
    %201 = arith.mulf %194, %200 : vector<4x1xf32>
    %202 = arith.divf %188, %201 : vector<4x1xf32>
    %203 = vector.shape_cast %202 : vector<4x1xf32> to vector<1x4x1xf32>
    %cst_88 = arith.constant dense<0.000000e+00> : vector<1xf32>
    %204 = vector.multi_reduction <add>, %203, %cst_88 [1, 2] : vector<1x4x1xf32> to vector<1xf32>
    %205 = vector.shape_cast %204 : vector<1xf32> to vector<1x1x1xf32>
    %206 = vector.extract %205[0, 0, 0] : f32 from vector<1x1x1xf32>
    %cst_89 = arith.constant 4.000000e+00 : f32
    %207 = arith.divf %206, %cst_89 : f32
    %cst_90 = arith.constant 1.000000e+00 : f32
    %208 = arith.subf %cst_90, %207 : f32
    %c0_91 = arith.constant 0 : index
    %c0_92 = arith.constant 0 : index
    %209 = memref.load %arg22[%c0_91, %c0_92] : memref<1x1xf32, #tpu.memory_space<smem>>
    memref.store %208, %arg22[%c0_91, %c0_92] : memref<1x1xf32, #tpu.memory_space<smem>>
    return
  }
}

</mosaic_0001>

<bundles_post_ra>
// kernel: byol_forward.2
= control target key start
LH: loop header
LB: loop body
LE: loop exit
PB: predicated region body
PF: predicated region fallthrough
CT: control target
= control target key end

     0   :  { %vm21_vm0 = vcmask 1043456   ;;  %v34_v20 = vlaneseq  ;;  %vm44_vm1 = vcmask 1041409   ;;  %vm47_vm2 = vcmask 25600   ;;  %s138_s1 = inlined_call_operand.vmem [shape: f32[2,4,256], index: 1, kind: input, shape index: {}]   ;;  %s139_s0 = inlined_call_operand.vmem [shape: f32[2,4,256], index: 0, kind: input, shape index: {}]   ;;  %s140_s3 = inlined_call_operand.vmem [shape: f32[2,4], index: 3, kind: output, shape index: {1}]   ;;  %s141_s2 = inlined_call_operand.vmem [shape: f32[2,4], index: 2, kind: output, shape index: {0}]  }
   0x1   :  { %v49_v0 = vld [vmem:[%s138_s1] sm:$0xff]  ;;  %v50_v2 = vld [vmem:[%s138_s1 + $0x8] sm:$0xff] }
   0x2   :  { %v13_v1 = vld [vmem:[%s139_s0] sm:$0xff]  ;;  %v53_v3 = vcombine.high %v49_v0, %v49_v0  ;;  %v57_v4 = vsel %vm21_vm0, %v49_v0, 0.0  ;;  %v14_v7 = vld [vmem:[%s139_s0 + $0x8] sm:$0xff]  ;;  %v54_v8 = vcombine.high %v50_v2, %v50_v2  ;;  %v62_v12 = vsel %vm21_vm0, %v50_v2, 0.0 }
   0x3   :  { %v17_v5 = vcombine.high %v13_v1, %v13_v1  ;;  %v22_v6 = vsel %vm21_vm0, %v13_v1, 0.0  ;;  %v18_v9 = vcombine.high %v14_v7, %v14_v7  ;;  %v27_v13 = vsel %vm21_vm0, %v14_v7, 0.0 }
   0x4   :  { %v58_v10 = vsel %vm21_vm0, %v53_v3, 0.0  ;;  %v63_v16 = vsel %vm21_vm0, %v54_v8, 0.0  ;;  %v35_v21 = vand.u32 127, %v34_v20  ;;  %v37_v22 = vshrl.u32 %v34_v20, 7 }
   0x5   :  { %v23_v11 = vsel %vm21_vm0, %v17_v5, 0.0  ;;  %v59_v14 = vadd.f32 %v58_v10, %v57_v4  ;;  %v28_v17 = vsel %vm21_vm0, %v18_v9, 0.0  ;;  %v64_v18 = vadd.f32 %v63_v16, %v62_v12 }
   0x6   :  { %v24_v15 = vadd.f32 %v23_v11, %v22_v6  ;;  %v29_v19 = vadd.f32 %v28_v17, %v27_v13  ;;  %v38_v25 = vsub.s32 %v35_v21, %v37_v22 }
   0x7   :  { %60 = vadd.xlane.f32.xlu1 %v59_v14 }
   0x8   :  { %25 = vadd.xlane.f32.xlu0 %v24_v15 }
   0xb   :  { %65 = vadd.xlane.f32.xlu1 %v64_v18 }
   0xc   :  { %30 = vadd.xlane.f32.xlu0 %v29_v19 }
  0x94   :  { %v61_v23 = vpop.xlane.xlu1 %60 }
  0x95   :  { %v26_v24 = vpop.xlane.xlu0 %25  ;;  %v72_v28 = vrot.slane %v61_v23, %v38_v25 }
  0x96   :  { %v39_v29 = vrot.slane %v26_v24, %v38_v25 }
  0x98   :  { %v66_v26 = vpop.xlane.xlu1 %65 }
  0x99   :  { %v31_v27 = vpop.xlane.xlu0 %30  ;;  %v76_v30 = vrot.slane %v66_v26, %v38_v25 }
  0x9a   :  { %v43_v31 = vrot.slane %v31_v27, %v38_v25 }
  0x9b   :  { %v77_v32 = vsel %vm44_vm1, %v76_v30, %v72_v28 }
  0x9c   :  { %v45_v33 = vsel %vm44_vm1, %v43_v31, %v39_v29  ;;  %79 = vst.msk [vmem:[%s140_s3] sm:$0x3] %vm47_vm2, %v77_v32 }
  0x9d   :  { %48 = vst.msk [vmem:[%s141_s2] sm:$0x3] %vm47_vm2, %v45_v33 }

// kernel: byol_forward.3
= control target key start
LH: loop header
LB: loop body
LE: loop exit
PB: predicated region body
PF: predicated region fallthrough
CT: control target
= control target key end

     0   :  { %s1548_s0 = inlined_call_operand.vmem [shape: f32[2,4], index: 0, kind: input, shape index: {}]   ;;  %s1549_s1 = inlined_call_operand.vmem [shape: f32[2,4], index: 1, kind: input, shape index: {}]   ;;  %s1550_s2 = inlined_call_operand.vmem [shape: f32[4,64], index: 2, kind: input, shape index: {}]   ;;  %s1551_s3 = inlined_call_operand.vmem [shape: f32[1,64], index: 3, kind: input, shape index: {}]   ;;  %s1552_s4 = inlined_call_operand.vmem [shape: f32[32,64], index: 4, kind: input, shape index: {}]   ;;  %s1553_s5 = inlined_call_operand.vmem [shape: f32[1,64], index: 5, kind: input, shape index: {}]   ;;  %s1554_s6 = inlined_call_operand.vmem [shape: f32[1,64], index: 6, kind: input, shape index: {}]   ;;  %s1555_s7 = inlined_call_operand.vmem [shape: f32[1,64], index: 7, kind: input, shape index: {}]   ;;  %s1556_s8 = inlined_call_operand.vmem [shape: f32[64,32], index: 8, kind: input, shape index: {}]   ;;  %s1557_s9 = inlined_call_operand.vmem [shape: f32[1,32], index: 9, kind: input, shape index: {}]   ;;  %s1558_s10 = inlined_call_operand.vmem [shape: f32[32,64], index: 10, kind: input, shape index: {}]   ;;  %s1559_s11 = inlined_call_operand.vmem [shape: f32[1,64], index: 11, kind: input, shape index: {}]   ;;  %s1560_s12 = inlined_call_operand.vmem [shape: f32[1,64], index: 12, kind: input, shape index: {}]   ;;  %s1561_s13 = inlined_call_operand.vmem [shape: f32[1,64], index: 13, kind: input, shape index: {}]   ;;  %s1562_s14 = inlined_call_operand.vmem [shape: f32[64,32], index: 14, kind: input, shape index: {}]   ;;  %s1563_s15 = inlined_call_operand.vmem [shape: f32[1,32], index: 15, kind: input, shape index: {}]   ;;  %s1564_s16 = inlined_call_operand.vmem [shape: f32[32,64], index: 16, kind: input, shape index: {}]   ;;  %s1565_s17 = inlined_call_operand.vmem [shape: f32[1,64], index: 17, kind: input, shape index: {}]   ;;  %s1566_s18 = inlined_call_operand.vmem [shape: f32[1,64], index: 18, kind: input, shape index: {}]   ;;  %s1567_s19 = inlined_call_operand.vmem [shape: f32[1,64], index: 19, kind: input, shape index: {}]   ;;  %s1568_s20 = inlined_call_operand.vmem [shape: f32[64,32], index: 20, kind: input, shape index: {}]   ;;  %s1569_s21 = inlined_call_operand.vmem [shape: f32[1,32], index: 21, kind: input, shape index: {}]   ;;  %s1570_s22 = inlined_call_operand.hbm [shape: f32[1,1], index: 22, kind: output, shape index: {}]  }
   0x1   :  { %1572 = sst [smem:[#allocation5_spill]] %s1548_s0 }
   0x2   :  { %1573 = sst [smem:[#allocation6_spill]] %s1549_s1 }
   0x3   :  { %1574 = sst [smem:[#allocation7_spill]] %s1550_s2 }
   0x4   :  { %1575 = sst [smem:[#allocation8_spill]] %s1551_s3 }
   0x5   :  { %1576 = sst [smem:[#allocation9_spill]] %s1552_s4 }
   0x6   :  { %1577 = sst [smem:[#allocation10_spill]] %s1553_s5 }
   0x7   :  { %1578 = sst [smem:[#allocation11_spill]] %s1554_s6 }
   0x8   :  { %s1579_s29 = sld [smem:[#allocation7_spill]]  ;;  %vm92_vm0 = vcmask 1043456   ;;  %v1204_v1 = vmov 0.0   ;;  %vm1205_vm1 = vmmov 0   ;;  %s1580_s0 = sld [smem:[#allocation5_spill]]  ;;  %vm77_vm2 = vcmask 1041408  }
   0x9   :  { %1018 = vmatprep.subr.mxu1 %v1204_v1  ;;  %1020 = vmatprep.mubr.msk.f32.mxu1 %vm1205_vm1, %v1204_v1  ;;  %s1581_s5 = sld [smem:[#allocation6_spill]]  ;;  %s1582_s25 = sld [smem:[#allocation9_spill]]  ;;  %v1206_v7 = vmov 0.0|0.0  }
   0xa   :  { %1119 = vmatprep.subr.bf16.mxu0 %v1206_v7  ;;  %1050 = vmatprep.mubr.msk.f32.mxu0 %vm1205_vm1, %v1204_v1 }
   0xe   :  { %v80_v0 = vld [vmem:[%s1579_s29] sm:$0xf] }
   0xf   :  { %v72_v2 = vld [vmem:[%s1580_s0] sm:$0x3]  ;;  %1019 = vmatpush3.msk.msra.mxu1 %vm92_vm0, %v80_v0  ;;  %v167_v6 = vld [vmem:[%s1582_s25 + $0x8] sm:$0xff] }
  0x10   :  { %v73_v3 = vld [vmem:[%s1581_s5] sm:$0x3]  ;;  %1113 = vmatprep.subr.bf16.mxu1 %v1206_v7 }
  0x11   :  { %v75_v4 = vrot.slane %v73_v3, 6  ;;  %v166_v5 = vld [vmem:[%s1582_s25] sm:$0xff] }
  0x12   :  { %27 = vsyncpa [#allocation3], 0  ;;  %vm88_vm3 = vcmask 31744   ;;  %v1114_v9 = vpack.c.bf16 %v167_v6, %v166_v5  ;;  %v168_v11 = vld [vmem:[%s1582_s25 + $0x10] sm:$0xff]  ;;  %v169_v12 = vld [vmem:[%s1582_s25 + $0x18] sm:$0xff]  ;;  %s1583_s0 = sld [smem:[#allocation8_spill]] }
  0x13   :  { %v78_v8 = vsel %vm77_vm2, %v72_v2, %v75_v4  ;;  %v1117_v13 = vpack.c.bf16 %v169_v12, %v168_v11  ;;  %vm177_vm4 = vcmask 261120   ;;  %s1207_s23 = smov 96   ;;  %v319_v18 = vld [vmem:[%s1556_s8] sm:$0xff]  ;;  %v320_v19 = vld [vmem:[%s1556_s8 + $0x8] sm:$0xff]  ;;  %v321_v21 = vld [vmem:[%s1556_s8 + $0x10] sm:$0xff]  ;;  %s1584_s2 = sld [smem:[#allocation10_spill]] }
  0x14   :  { %v79_v10 = vmul.f32 0.00390625, %v78_v8  ;;  %v1120_v20 = vpack.c.bf16 %v320_v19, %v319_v18  ;;  %v322_v22 = vld [vmem:[%s1556_s8 + $0x18] sm:$0xff]  ;;  %v323_v24 = vld [vmem:[%s1556_s8 + $0x20] sm:$0xff]  ;;  %v324_v25 = vld [vmem:[%s1556_s8 + $0x28] sm:$0xff]  ;;  %vm251_vm5 = vcmask 517120   ;;  %s1585_s28 = sld [smem:[#allocation11_spill]] }
  0x15   :  { %v1123_v23 = vpack.c.bf16 %v322_v22, %v321_v21  ;;  %v1126_v26 = vpack.c.bf16 %v324_v25, %v323_v24  ;;  %v325_v27 = vld [vmem:[%s1556_s8 + $0x30] sm:$0xff]  ;;  %v326_v28 = vld [vmem:[%s1556_s8 + $0x38] sm:$0xff]  ;;  %v408_v30 = vld [vmem:[%s1564_s16] sm:$0xff]  ;;  %vm334_vm6 = vcmask 523264   ;;  %vm892_vm7 = vcmask 257024  }
  0x16   :  { %1021 = vmatmul.mubr.msk.f32.vlgmr.msra.gmra.mrb[0].mxu1 %vm88_vm3, %v79_v10  ;;  %1121 = vmatpush3.bf16.msra.mxu0 %v1120_v20  ;;  %v1129_v29 = vpack.c.bf16 %v326_v28, %v325_v27  ;;  %v409_v31 = vld [vmem:[%s1564_s16 + $0x8] sm:$0xff]  ;;  %v959_v21 = vld [vmem:[%s1555_s7] ss:$0 sm:$0xff]  ;;  %v648_v28 = vld [vmem:[%s1558_s10 + $0x10] sm:$0xff]  ;;  %vm923_vm12 = vcmask 3072  }
  0x17   :  { %1115 = vmatpush3.bf16.msra.mxu1 %v1114_v9  ;;  %1031 = vmatprep.mubr.msk.f32.mxu1 %vm1205_vm1, %v1204_v1  ;;  %v1132_v32 = vpack.c.bf16 %v409_v31, %v408_v30  ;;  %v647_v24 = vld [vmem:[%s1558_s10 + $0x8] sm:$0xff] }
  0x18   :  { %1116 = vmatprep.subr.bf16.mxu1 %v1206_v7  ;;  %v953_v14 = vld [vmem:[%s1583_s0] ss:$0 sm:$0xff]  ;;  %1122 = vmatprep.subr.bf16.mxu0 %v1206_v7 }
  0x19   :  { %v956_v33 = vld [vmem:[%s1584_s2] ss:$0 sm:$0xff] }
  0x1a   :  { %1124 = vmatpush3.bf16.msra.mxu0 %v1123_v23  ;;  %v958_v19 = vld [vmem:[%s1585_s28] ss:$0 sm:$0xff]  ;;  %s1192_s28 = scalar_lea.hbm %s1570_s22, 16 }
  0x1b   :  { %1118 = vmatpush3.bf16.msra.mxu1 %v1117_v13  ;;  %1125 = vmatprep.subr.bf16.mxu0 %v1206_v7  ;;  %v646_v23 = vld [vmem:[%s1558_s10] sm:$0xff]  ;;  %p1193_p0 = scmp.ne.s32.totalorder %s1570_s22, %s1192_s28  ;;  %p1196_p1 = scmp.lt.u32.totalorder %s1192_s28, %s1570_s22 }
  0x1c   :  { %1131 = vmatprep.subr.bf16.mxu1 %v1206_v7 }
  0x1d   :  { %p1198_p2 = pnand %p1196_p1, %p1193_p0 }
  0x1e   :  { %1127 = vmatpush3.bf16.msra.mxu0 %v1126_v26  ;;  %v1150_v26 = vpack.c.bf16 %v647_v24, %v646_v23 }
  0x1f   :  { %1128 = vmatprep.subr.bf16.mxu0 %v1206_v7 }
  0x22   :  { %1130 = vmatpush3.bf16.msra.mxu0 %v1129_v29  ;;  %v649_v29 = vld [vmem:[%s1558_s10 + $0x18] sm:$0xff] }
  0x23   :  { %1149 = vmatprep.subr.bf16.mxu0 %v1206_v7  ;;  %v1153_v30 = vpack.c.bf16 %v649_v29, %v648_v28 }
  0xe9   :  { %v162_v15 = vpop.f32.mrb[0].mxu1 }
  0xea   :  { %v163_v16 = vadd.f32 %v953_v14, %v162_v15  ;;  %v1022_v17 = vpop.f32.mrb[1].mxu1 }
  0xec   :  { %657 = vrot.lane.b32.xlu0 %v163_v16, %s1207_s23  ;;  %1032 = vmatmul.mubr.msk.f32.vlgmr.msra.gmra.mrb[2].mxu1 %vm177_vm4, %v163_v16 }
  0xed   :  { %1061 = vmatprep.mubr.msk.f32.mxu1 %vm1205_vm1, %v1204_v1  ;;  %1133 = vmatpush3.bf16.msra.mxu1 %v1132_v32  ;;  %v410_v32 = vld [vmem:[%s1564_s16 + $0x10] sm:$0xff] }
  0xee   :  { %1134 = vmatprep.subr.bf16.mxu1 %v1206_v7 }
 0x15e   :  { %v658_v31 = vpop.permute.xlu0 %657 }
 0x1bf   :  { %v247_v34 = vpop.f32.mrb[2].mxu1 }
 0x1c0   :  { %v248_v35 = vadd.f32 %v956_v33, %v247_v34  ;;  %v1033_v36 = vpop.f32.mrb[3].mxu1  ;;  %v411_v33 = vld [vmem:[%s1564_s16 + $0x18] sm:$0xff] }
 0x1c1   :  { %v1135_v34 = vpack.c.bf16 %v411_v33, %v410_v32  ;;  %v798_v36 = vld [vmem:[%s1562_s14 + $0x8] sm:$0xff] }
 0x1c2   :  { %v252_v37 = vsel %vm251_vm5, %v248_v35, 0.0  ;;  %v275_v38 = vrot.slane %v248_v35, 2 }
 0x1c3   :  { %v253_v39 = vrot.slane %v252_v37, 4  ;;  %1136 = vmatpush3.bf16.msra.mxu1 %v1135_v34 }
 0x1c4   :  { %v277_v40 = vsel %vm251_vm5, %v275_v38, 0.0  ;;  %1137 = vmatprep.subr.bf16.mxu1 %v1206_v7  ;;  %v799_v38 = vld [vmem:[%s1562_s14 + $0x10] sm:$0xff] }
 0x1c5   :  { %v254_v41 = vadd.f32 %v253_v39, %v252_v37  ;;  %v278_v42 = vrot.slane %v277_v40, 4  ;;  %v800_v39 = vld [vmem:[%s1562_s14 + $0x18] sm:$0xff] }
 0x1c7   :  { %v255_v43 = vrot.slane %v254_v41, 2  ;;  %v279_v44 = vadd.f32 %v278_v42, %v277_v40  ;;  %v1159_v40 = vpack.c.bf16 %v800_v39, %v799_v38  ;;  %v802_v42 = vld [vmem:[%s1562_s14 + $0x28] sm:$0xff]  ;;  %v971_v38 = vld [vmem:[%s1561_s13] ss:$0 sm:$0xff] }
 0x1c9   :  { %v256_v45 = vadd.f32 %v255_v43, %v254_v41  ;;  %v280_v46 = vrot.slane %v279_v44, 2  ;;  %v801_v41 = vld [vmem:[%s1562_s14 + $0x20] sm:$0xff] }
 0x1ca   :  { %v1162_v43 = vpack.c.bf16 %v802_v42, %v801_v41  ;;  %v558_v42 = vld [vmem:[%s1568_s20] sm:$0xff] }
 0x1cb   :  { %v257_v47 = vrot.slane %v256_v45, 1  ;;  %v281_v48 = vadd.f32 %v280_v46, %v279_v44  ;;  %v803_v44 = vld [vmem:[%s1562_s14 + $0x30] sm:$0xff] }
 0x1cd   :  { %v258_v49 = vadd.f32 %v257_v47, %v256_v45  ;;  %v282_v50 = vrot.slane %v281_v48, 1  ;;  %v804_v45 = vld [vmem:[%s1562_s14 + $0x38] sm:$0xff]  ;;  %v960_v47 = vld [vmem:[%s1557_s9] ss:$0 sm:$0xff] }
 0x1ce   :  { %v1165_v46 = vpack.c.bf16 %v804_v45, %v803_v44  ;;  %v560_v45 = vld [vmem:[%s1568_s20 + $0x10] sm:$0xff] }
 0x1cf   :  { %v260_v51 = vmul.f32 0.5, %v258_v49  ;;  %v283_v52 = vadd.f32 %v282_v50, %v281_v48 }
 0x1d1   :  { %v261_v53 = vsub.f32 %v248_v35, %v260_v51  ;;  %v284_v54 = vmul.f32 0.5, %v283_v52  ;;  %v968_v51 = vld [vmem:[%s1559_s11] ss:$0 sm:$0xff] }
 0x1d3   :  { %v262_v55 = vmul.f32 %v261_v53, %v261_v53  ;;  %v285_v56 = vsub.f32 %v248_v35, %v284_v54  ;;  %v797_v35 = vld [vmem:[%s1562_s14] sm:$0xff] }
 0x1d4   :  { %v1156_v37 = vpack.c.bf16 %v798_v36, %v797_v35  ;;  %v970_v36 = vld [vmem:[%s1560_s12] ss:$0 sm:$0xff] }
 0x1d5   :  { %v263_v57 = vsel %vm251_vm5, %v262_v55, 0.0  ;;  %v286_v58 = vmul.f32 %v285_v56, %v285_v56 }
 0x1d6   :  { %v264_v59 = vrot.slane %v263_v57, 4 }
 0x1d7   :  { %v288_v60 = vrot.slane %v286_v58, 2 }
 0x1d8   :  { %v265_v61 = vadd.f32 %v264_v59, %v263_v57 }
 0x1d9   :  { %v290_v62 = vsel %vm251_vm5, %v288_v60, 0.0 }
 0x1da   :  { %v266_v63 = vrot.slane %v265_v61, 2  ;;  %v291_v0 = vrot.slane %v290_v62, 4 }
 0x1dc   :  { %v267_v2 = vadd.f32 %v266_v63, %v265_v61  ;;  %v292_v3 = vadd.f32 %v291_v0, %v290_v62 }
 0x1de   :  { %v268_v4 = vrot.slane %v267_v2, 1  ;;  %v293_v5 = vrot.slane %v292_v3, 2 }
 0x1e0   :  { %v269_v6 = vadd.f32 %v268_v4, %v267_v2  ;;  %v294_v8 = vadd.f32 %v293_v5, %v292_v3 }
 0x1e2   :  { %v270_v9 = vmul.f32 0.5, %v269_v6  ;;  %v295_v10 = vrot.slane %v294_v8, 1 }
 0x1e4   :  { %v271_v11 = vadd.f32 1e-05, %v270_v9  ;;  %v296_v12 = vadd.f32 %v295_v10, %v294_v8 }
 0x1e6   :  { %v297_v13 = vmul.f32 0.5, %v296_v12  ;;  %1174 = vrsqrt.f32 %v271_v11 }
 0x1e8   :  { %v298_v14 = vadd.f32 1e-05, %v297_v13 }
 0x1ea   :  { %1176 = vrsqrt.f32 %v298_v14 }
 0x1f0   :  { %v1175_v15 = vpop.eup %1174 }
 0x1f1   :  { %v273_v17 = vmul.f32 %v1175_v15, %v261_v53 }
 0x1f4   :  { %v1177_v16 = vpop.eup %1176 }
 0x1f5   :  { %v300_v18 = vmul.f32 %v1177_v16, %v285_v56 }
 0x1f7   :  { %v301_v20 = vsel %vm77_vm2, %v273_v17, %v300_v18 }
 0x1f8   :  { %v309_v22 = vmul.f32 %v958_v19, %v301_v20 }
 0x1fa   :  { %v317_v25 = vadd.f32 %v959_v21, %v309_v22 }
 0x1fc   :  { %v318_v27 = vmax.f32 %v317_v25, 0.0 }
 0x1fe   :  { %1051 = vmatmul.mubr.msk.f32.vlgmr.msra.gmra.mrb[0].mxu0 %vm334_vm6, %v318_v27 }
 0x1ff   :  { %1151 = vmatpush3.bf16.msra.mxu0 %v1150_v26  ;;  %1091 = vmatprep.mubr.msk.f32.mxu0 %vm1205_vm1, %v1204_v1 }
 0x200   :  { %1152 = vmatprep.subr.bf16.mxu0 %v1206_v7 }
 0x203   :  { %1154 = vmatpush3.bf16.msra.mxu0 %v1153_v30 }
 0x204   :  { %1155 = vmatprep.subr.bf16.mxu0 %v1206_v7 }
 0x206   :  { %1092 = vmatmul.mubr.msk.f32.vlgmr.msra.gmra.mrb[2].mxu0 %vm177_vm4, %v658_v31 }
 0x207   :  { %1110 = vmatprep.mubr.msk.f32.mxu0 %vm1205_vm1, %v1204_v1  ;;  %1157 = vmatpush3.bf16.msra.mxu0 %v1156_v37 }
 0x208   :  { %1158 = vmatprep.subr.bf16.mxu0 %v1206_v7 }
 0x20b   :  { %1160 = vmatpush3.bf16.msra.mxu0 %v1159_v40 }
 0x20c   :  { %1161 = vmatprep.subr.bf16.mxu0 %v1206_v7 }
 0x20f   :  { %1163 = vmatpush3.bf16.msra.mxu0 %v1162_v43  ;;  %v559_v43 = vld [vmem:[%s1568_s20 + $0x8] sm:$0xff] }
 0x210   :  { %1164 = vmatprep.subr.bf16.mxu0 %v1206_v7  ;;  %v1138_v44 = vpack.c.bf16 %v559_v43, %v558_v42 }
 0x213   :  { %1166 = vmatpush3.bf16.msra.mxu0 %v1165_v46  ;;  %v561_v46 = vld [vmem:[%s1568_s20 + $0x18] sm:$0xff] }
 0x2d1   :  { %v404_v48 = vpop.f32.mrb[0].mxu0 }
 0x2d2   :  { %v405_v49 = vadd.f32 %v960_v47, %v404_v48  ;;  %v1052_v50 = vpop.f32.mrb[1].mxu0  ;;  %v1141_v47 = vpack.c.bf16 %v561_v46, %v560_v45  ;;  %v562_v48 = vld [vmem:[%s1568_s20 + $0x20] sm:$0xff] }
 0x2d4   :  { %1062 = vmatmul.mubr.msk.f32.vlgmr.msra.gmra.mrb[4].mxu1 %vm177_vm4, %v405_v49  ;;  %v563_v49 = vld [vmem:[%s1568_s20 + $0x28] sm:$0xff] }
 0x2d5   :  { %1080 = vmatprep.mubr.msk.f32.mxu1 %vm1205_vm1, %v1204_v1  ;;  %1139 = vmatpush3.bf16.msra.mxu1 %v1138_v44  ;;  %v1144_v50 = vpack.c.bf16 %v563_v49, %v562_v48  ;;  %v972_v44 = vld [vmem:[%s1563_s15] ss:$0 sm:$0xff] }
 0x2d6   :  { %1140 = vmatprep.subr.bf16.mxu1 %v1206_v7 }
 0x2d9   :  { %v727_v52 = vpop.f32.mrb[2].mxu0  ;;  %1142 = vmatpush3.bf16.msra.mxu1 %v1141_v47 }
 0x2da   :  { %v728_v53 = vadd.f32 %v968_v51, %v727_v52  ;;  %v1093_v54 = vpop.f32.mrb[3].mxu0  ;;  %1143 = vmatprep.subr.bf16.mxu1 %v1206_v7  ;;  %v564_v51 = vld [vmem:[%s1568_s20 + $0x30] sm:$0xff]  ;;  %v565_v52 = vld [vmem:[%s1568_s20 + $0x38] sm:$0xff] }
 0x2db   :  { %v962_v54 = vld [vmem:[%s1565_s17] ss:$0 sm:$0xff] }
 0x2dc   :  { %v731_v55 = vsel %vm251_vm5, %v728_v53, 0.0  ;;  %v753_v56 = vrot.slane %v728_v53, 2 }
 0x2dd   :  { %v732_v57 = vrot.slane %v731_v55, 4  ;;  %1145 = vmatpush3.bf16.msra.mxu1 %v1144_v50 }
 0x2de   :  { %v755_v58 = vsel %vm251_vm5, %v753_v56, 0.0  ;;  %1146 = vmatprep.subr.bf16.mxu1 %v1206_v7 }
 0x2df   :  { %v733_v59 = vadd.f32 %v732_v57, %v731_v55  ;;  %v756_v60 = vrot.slane %v755_v58, 4 }
 0x2e1   :  { %v734_v61 = vrot.slane %v733_v59, 2  ;;  %v757_v62 = vadd.f32 %v756_v60, %v755_v58 }
 0x2e3   :  { %v735_v63 = vadd.f32 %v734_v61, %v733_v59  ;;  %v758_v0 = vrot.slane %v757_v62, 2 }
 0x2e5   :  { %v736_v1 = vrot.slane %v735_v63, 1  ;;  %v759_v2 = vadd.f32 %v758_v0, %v757_v62 }
 0x2e7   :  { %v737_v3 = vadd.f32 %v736_v1, %v735_v63  ;;  %v760_v4 = vrot.slane %v759_v2, 1 }
 0x2e9   :  { %v738_v5 = vmul.f32 0.5, %v737_v3  ;;  %v761_v6 = vadd.f32 %v760_v4, %v759_v2 }
 0x2eb   :  { %v739_v8 = vsub.f32 %v728_v53, %v738_v5  ;;  %v762_v9 = vmul.f32 0.5, %v761_v6 }
 0x2ed   :  { %v740_v10 = vmul.f32 %v739_v8, %v739_v8  ;;  %v763_v11 = vsub.f32 %v728_v53, %v762_v9  ;;  %v1147_v53 = vpack.c.bf16 %v565_v52, %v564_v51 }
 0x2ef   :  { %v741_v12 = vsel %vm251_vm5, %v740_v10, 0.0  ;;  %v764_v13 = vmul.f32 %v763_v11, %v763_v11  ;;  %1148 = vmatpush3.bf16.msra.mxu1 %v1147_v53  ;;  %v966_v53 = vld [vmem:[%s1569_s21] ss:$0 sm:$0xff] }
 0x2f0   :  { %v742_v14 = vrot.slane %v741_v12, 4 }
 0x2f1   :  { %v766_v15 = vrot.slane %v764_v13, 2 }
 0x2f2   :  { %v743_v16 = vadd.f32 %v742_v14, %v741_v12 }
 0x2f3   :  { %v768_v17 = vsel %vm251_vm5, %v766_v15, 0.0 }
 0x2f4   :  { %v744_v18 = vrot.slane %v743_v16, 2  ;;  %v769_v19 = vrot.slane %v768_v17, 4 }
 0x2f6   :  { %v745_v20 = vadd.f32 %v744_v18, %v743_v16  ;;  %v770_v21 = vadd.f32 %v769_v19, %v768_v17 }
 0x2f8   :  { %v746_v22 = vrot.slane %v745_v20, 1  ;;  %v771_v23 = vrot.slane %v770_v21, 2 }
 0x2fa   :  { %v747_v24 = vadd.f32 %v746_v22, %v745_v20  ;;  %v772_v25 = vadd.f32 %v771_v23, %v770_v21 }
 0x2fc   :  { %v748_v26 = vmul.f32 0.5, %v747_v24  ;;  %v773_v27 = vrot.slane %v772_v25, 1 }
 0x2fe   :  { %v749_v28 = vadd.f32 1e-05, %v748_v26  ;;  %v774_v29 = vadd.f32 %v773_v27, %v772_v25 }
 0x300   :  { %v775_v30 = vmul.f32 0.5, %v774_v29  ;;  %1178 = vrsqrt.f32 %v749_v28 }
 0x302   :  { %v776_v31 = vadd.f32 1e-05, %v775_v30 }
 0x304   :  { %1180 = vrsqrt.f32 %v776_v31 }
 0x30a   :  { %v1179_v32 = vpop.eup %1178 }
 0x30b   :  { %v751_v34 = vmul.f32 %v1179_v32, %v739_v8 }
 0x30e   :  { %v1181_v33 = vpop.eup %1180 }
 0x30f   :  { %v778_v35 = vmul.f32 %v1181_v33, %v763_v11 }
 0x311   :  { %v779_v37 = vsel %vm77_vm2, %v751_v34, %v778_v35 }
 0x312   :  { %v787_v39 = vmul.f32 %v970_v36, %v779_v37 }
 0x314   :  { %v795_v40 = vadd.f32 %v971_v38, %v787_v39  ;;  %v964_v38 = vld [vmem:[%s1566_s18] ss:$0 sm:$0xff] }
 0x316   :  { %v796_v41 = vmax.f32 %v795_v40, 0.0  ;;  %v965_v40 = vld [vmem:[%s1567_s19] ss:$0 sm:$0xff] }
 0x318   :  { %1111 = vmatmul.mubr.msk.f32.vlgmr.msra.gmra.mrb[4].mxu0 %vm334_vm6, %v796_v41 }
 0x3a7   :  { %v488_v55 = vpop.f32.mrb[4].mxu1 }
 0x3a8   :  { %v489_v56 = vadd.f32 %v962_v54, %v488_v55  ;;  %v1063_v57 = vpop.f32.mrb[5].mxu1 }
 0x3aa   :  { %v492_v58 = vsel %vm251_vm5, %v489_v56, 0.0  ;;  %v514_v59 = vrot.slane %v489_v56, 2 }
 0x3ab   :  { %v493_v60 = vrot.slane %v492_v58, 4 }
 0x3ac   :  { %v516_v61 = vsel %vm251_vm5, %v514_v59, 0.0 }
 0x3ad   :  { %v494_v62 = vadd.f32 %v493_v60, %v492_v58  ;;  %v517_v63 = vrot.slane %v516_v61, 4 }
 0x3af   :  { %v495_v0 = vrot.slane %v494_v62, 2  ;;  %v518_v1 = vadd.f32 %v517_v63, %v516_v61 }
 0x3b1   :  { %v496_v2 = vadd.f32 %v495_v0, %v494_v62  ;;  %v519_v7 = vrot.slane %v518_v1, 2 }
 0x3b3   :  { %v497_v3 = vrot.slane %v496_v2, 1  ;;  %v520_v4 = vadd.f32 %v519_v7, %v518_v1 }
 0x3b5   :  { %v498_v5 = vadd.f32 %v497_v3, %v496_v2  ;;  %v521_v6 = vrot.slane %v520_v4, 1 }
 0x3b7   :  { %v499_v8 = vmul.f32 0.5, %v498_v5  ;;  %v522_v9 = vadd.f32 %v521_v6, %v520_v4 }
 0x3b9   :  { %v500_v10 = vsub.f32 %v489_v56, %v499_v8  ;;  %v523_v11 = vmul.f32 0.5, %v522_v9 }
 0x3bb   :  { %v501_v12 = vmul.f32 %v500_v10, %v500_v10  ;;  %v524_v13 = vsub.f32 %v489_v56, %v523_v11 }
 0x3bd   :  { %v502_v14 = vsel %vm251_vm5, %v501_v12, 0.0  ;;  %v525_v15 = vmul.f32 %v524_v13, %v524_v13 }
 0x3be   :  { %v503_v16 = vrot.slane %v502_v14, 4 }
 0x3bf   :  { %v527_v17 = vrot.slane %v525_v15, 2 }
 0x3c0   :  { %v504_v18 = vadd.f32 %v503_v16, %v502_v14 }
 0x3c1   :  { %v529_v19 = vsel %vm251_vm5, %v527_v17, 0.0 }
 0x3c2   :  { %v505_v20 = vrot.slane %v504_v18, 2  ;;  %v530_v21 = vrot.slane %v529_v19, 4 }
 0x3c4   :  { %v506_v22 = vadd.f32 %v505_v20, %v504_v18  ;;  %v531_v23 = vadd.f32 %v530_v21, %v529_v19 }
 0x3c6   :  { %v507_v24 = vrot.slane %v506_v22, 1  ;;  %v532_v25 = vrot.slane %v531_v23, 2 }
 0x3c8   :  { %v508_v26 = vadd.f32 %v507_v24, %v506_v22  ;;  %v533_v27 = vadd.f32 %v532_v25, %v531_v23 }
 0x3ca   :  { %v509_v28 = vmul.f32 0.5, %v508_v26  ;;  %v534_v29 = vrot.slane %v533_v27, 1 }
 0x3cc   :  { %v510_v30 = vadd.f32 1e-05, %v509_v28  ;;  %v535_v31 = vadd.f32 %v534_v29, %v533_v27 }
 0x3ce   :  { %v536_v32 = vmul.f32 0.5, %v535_v31  ;;  %1182 = vrsqrt.f32 %v510_v30 }
 0x3d0   :  { %v537_v33 = vadd.f32 1e-05, %v536_v32 }
 0x3d2   :  { %1184 = vrsqrt.f32 %v537_v33 }
 0x3d8   :  { %v1183_v34 = vpop.eup %1182 }
 0x3d9   :  { %v512_v36 = vmul.f32 %v1183_v34, %v500_v10 }
 0x3dc   :  { %v1185_v35 = vpop.eup %1184 }
 0x3dd   :  { %v539_v37 = vmul.f32 %v1185_v35, %v524_v13 }
 0x3df   :  { %v540_v39 = vsel %vm77_vm2, %v512_v36, %v539_v37 }
 0x3e0   :  { %v548_v41 = vmul.f32 %v964_v38, %v540_v39 }
 0x3e2   :  { %v556_v42 = vadd.f32 %v965_v40, %v548_v41 }
 0x3e4   :  { %v557_v43 = vmax.f32 %v556_v42, 0.0 }
 0x3e6   :  { %1081 = vmatmul.mubr.msk.f32.vlgmr.msra.gmra.mrb[6].mxu1 %vm334_vm6, %v557_v43 }
 0x3eb   :  { %v881_v45 = vpop.f32.mrb[4].mxu0 }
 0x3ec   :  { %v882_v46 = vadd.f32 %v972_v44, %v881_v45  ;;  %v1112_v47 = vpop.f32.mrb[5].mxu0 }
 0x3ee   :  { %v886_v48 = vrot.slane %v882_v46, 2  ;;  %v888_v49 = vrot.slane %v882_v46, 6 }
 0x3f0   :  { %v890_v50 = vsel %vm77_vm2, %v886_v48, %v888_v49 }
 0x3f1   :  { %v908_v51 = vmul.f32 %v890_v50, %v890_v50 }
 0x3f3   :  { %v909_v52 = vsel %vm892_vm7, %v908_v51, 0.0 }
 0x3f4   :  { %910 = vadd.xlane.f32.xlu1 %v909_v52 }
 0x481   :  { %v911_v61 = vpop.xlane.xlu1 %910 }
 0x482   :  { %1186 = vrsqrt.f32 %v911_v61  ;;  %vm914_vm8 = vcmp.eq.f32.partialorder %v911_v61, inf  ;;  %v917_v7 = vand.u32 2147483648, %v911_v61  ;;  %vm916_vm9 = vcmp.eq.f32.partialorder %v911_v61, 0.0 }
 0x48c   :  { %v1187_v63 = vpop.eup %1186 }
 0x48d   :  { %v913_v0 = vmul.f32 %v1187_v63, %v911_v61 }
 0x48f   :  { %v915_v1 = vsel %vm914_vm8, %v911_v61, %v913_v0 }
 0x490   :  { %v918_v4 = vsel %vm916_vm9, %v917_v7, %v915_v1 }
 0x491   :  { %v919_v10 = vmax.f32 %v918_v4, 1e-08 }
 0x4b9   :  { %v642_v54 = vpop.f32.mrb[6].mxu1 }
 0x4ba   :  { %v643_v55 = vadd.f32 %v966_v53, %v642_v54  ;;  %v1082_v56 = vpop.f32.mrb[7].mxu1 }
 0x4bc   :  { %v896_v57 = vmul.f32 %v643_v55, %v643_v55  ;;  %v891_v58 = vmul.f32 %v890_v50, %v643_v55 }
 0x4be   :  { %v897_v59 = vsel %vm892_vm7, %v896_v57, 0.0  ;;  %v893_v60 = vsel %vm892_vm7, %v891_v58, 0.0 }
 0x4bf   :  { %898 = vadd.xlane.f32.xlu0 %v897_v59  ;;  %894 = vadd.xlane.f32.xlu1 %v893_v60 }
 0x54c   :  { %v899_v62 = vpop.xlane.xlu0 %898  ;;  %v895_v13 = vpop.xlane.xlu1 %894 }
 0x54d   :  { %1188 = vrsqrt.f32 %v899_v62  ;;  %vm902_vm10 = vcmp.eq.f32.partialorder %v899_v62, inf  ;;  %v905_v5 = vand.u32 2147483648, %v899_v62  ;;  %vm904_vm11 = vcmp.eq.f32.partialorder %v899_v62, 0.0 }
 0x557   :  { %v1189_v2 = vpop.eup %1188 }
 0x558   :  { %v901_v3 = vmul.f32 %v1189_v2, %v899_v62 }
 0x55a   :  { %v903_v6 = vsel %vm902_vm10, %v899_v62, %v901_v3 }
 0x55b   :  { %v906_v8 = vsel %vm904_vm11, %v905_v5, %v903_v6 }
 0x55c   :  { %v907_v9 = vmax.f32 %v906_v8, 1e-08 }
 0x55e   :  { %v920_v11 = vmul.f32 %v919_v10, %v907_v9 }
 0x560   :  { %1190 = vrcp.f32 %v920_v11 }
 0x56a   :  { %v1191_v12 = vpop.eup %1190 }
 0x56b   :  { %v922_v14 = vmul.f32 %v1191_v12, %v895_v13 }
 0x56d   :  { %v924_v15 = vsel %vm923_vm12, %v922_v14, 0.0 }
 0x56e   :  { %925 = vadd.xlane.f32.xlu1 %v924_v15 }
 0x5fb   :  { %v926_v16 = vpop.xlane.xlu1 %925 }
 0x5fc   :  { %v927_v17 = vrot.slane %v926_v16, 4 }
 0x5fe   :  { %v928_v18 = vadd.f32 %v927_v17, %v926_v16 }
 0x600   :  { %v929_v19 = vrot.slane %v928_v18, 2 }
 0x602   :  { %v930_v20 = vadd.f32 %v929_v19, %v928_v18 }
 0x604   :  { %v931_v21 = vrot.slane %v930_v20, 1 }
 0x606   :  { %v932_v22 = vadd.f32 %v931_v21, %v930_v20 }
 0x608   :  { %1167 = vpush %v932_v22 }
 0x639   :  { %s1168_s15 = spop %1167 }
 0x63a   :  { %s936_s21 = smul.f32 0.25, %s1168_s15 }
 0x63c   :  { %s937_s14 = ssub.f32 1.0, %s936_s21 }
 0x63e   :  { %939 = sst [smem:[#allocation2]] %s937_s14 }
 0x63f   :  { %1201 = shalt.err (!%p1198_p2)
}
 0x640   :  { %s1208_s13 = smov [#allocation2]  }
 0x641   :  { %947 = dma.smem_to_hbm %s1208_s13, 16, %s1570_s22, [#allocation3]  }
 0x642   :  { %1202 = dma.done.wait [#allocation3], 16  }
 0x643   :  { %1203 = vsyncadd [#allocation3], 4294967280 }
 0x644   :  { %951 = sfence }
 0x645   :  { %952 = vsyncpa [#allocation3], 1 }

</bundles_post_ra>
